<compile_context>
chip_gen: v5e
topology: v5e:2x2
jax: 0.10.0
libtpu: 0.0.40
codegen_flags: <defaults>
</compile_context>

<pallas_src>
import jax
import jax.numpy as jnp
from jax.experimental import pallas as pl
from jax.experimental.pallas import tpu as pltpu


def _round_up(x, m):
    return (x + m - 1) // m * m


def match_lr_kernel(sub_ref, rev_ref, w2t_ref, b2_ref,
                    wa_ref, wd_ref, wm_ref,
                    wf_ref, bf_ref,
                    out_ref):
    # fc2(reviewer_emb) on the MXU, f32 accumulation.
    r = jnp.dot(rev_ref[...], w2t_ref[...],
                preferred_element_type=jnp.float32) + b2_ref[...]
    s = sub_ref[...]

    add = s + r
    diff = s - r
    multi = s * r

    # Elementwise weights + 3x tanh (VPU + EUP).
    h = (jnp.tanh(wa_ref[...] * add)
         + jnp.tanh(wd_ref[...] * diff)
         + jnp.tanh(wm_ref[...] * multi))

    # Fused (combined @ output) projection: D -> 1, done on the VPU/XLU
    # (broadcast multiply + lane reduction) instead of an N=1 MXU matmul.
    logit = jnp.sum(h * wf_ref[...], axis=-1, keepdims=True) + bf_ref[0, 0]
    out_ref[...] = 3.0 * jax.nn.sigmoid(logit)


def match_lr_forward(submitter_emb, reviewer_emb, params, *, tb=512):
    """Runs the fused Match_LR forward; tiles/pipelines over the batch dim."""
    B, D = submitter_emb.shape
    assert reviewer_emb.shape == (B, D)

    # Batch tile: multiple of 8 sublanes, capped by (padded) batch size.
    tb = max(8, min(tb, _round_up(B, 8)))
    tb = _round_up(tb, 8)
    b_pad = _round_up(B, tb)
    if b_pad != B:
        pad = ((0, b_pad - B), (0, 0))
        submitter_emb = jnp.pad(submitter_emb, pad)
        reviewer_emb = jnp.pad(reviewer_emb, pad)
    num_tiles = b_pad // tb

    # Activations stream tile-by-tile; weights are resident (constant index_map).
    act_spec = pl.BlockSpec((tb, D), lambda i: (i, 0))

    def resident(shape):
        return pl.BlockSpec(shape, lambda i: (0, 0))

    out = pl.pallas_call(
        match_lr_kernel,
        out_shape=jax.ShapeDtypeStruct((b_pad, 1), jnp.float32),
        grid=(num_tiles,),
        in_specs=[
            act_spec,                 # submitter_emb   [B, D]  (streamed)
            act_spec,                 # reviewer_emb    [B, D]  (streamed)
            resident((D, D)),         # w2_t            [D, D]  (resident)
            resident((1, D)),         # b2              [1, D]
            resident((1, D)),         # w_add           [1, D]
            resident((1, D)),         # w_diff          [1, D]
            resident((1, D)),         # w_multi         [1, D]
            resident((1, D)),         # w_fused         [1, D]  (combined∘output)
            pl.BlockSpec(memory_space=pltpu.MemorySpace.SMEM),  # b_fused (1,1)
        ],
        out_specs=pl.BlockSpec((tb, 1), lambda i: (i, 0)),
        compiler_params=pltpu.CompilerParams(
            dimension_semantics=("parallel",)),
    )(
        submitter_emb, reviewer_emb,
        params["w2_t"], params["b2"],
        params["w_add"], params["w_diff"], params["w_multi"],
        params["w_fused"], params["b_fused"],
    )
    return out[:B]


def init_params(key, submitter_emb_dim, reviewer_emb_dim):
    assert submitter_emb_dim == reviewer_emb_dim, \
        "elementwise ops in forward require equal dims"
    D = submitter_emb_dim
    HIDDEN = 128
    keys = jax.random.split(key, 8)
    initrange = 4.0

    # fc2: Linear(D, D); bias filled with 0 (as in init_weights).
    w2 = jax.random.uniform(keys[0], (D, D), jnp.float32,
                            -1.0 / jnp.sqrt(D), 1.0 / jnp.sqrt(D))
    b2 = jnp.zeros((1, D), jnp.float32)

    # elementwise weights: uniform(-4, 4)
    w_add = jax.random.uniform(keys[1], (1, D), jnp.float32, -initrange, initrange)
    w_diff = jax.random.uniform(keys[2], (1, D), jnp.float32, -initrange, initrange)
    w_multi = jax.random.uniform(keys[3], (1, D), jnp.float32, -initrange, initrange)

    # combined: Linear(D, 128)
    wc = jax.random.uniform(keys[4], (HIDDEN, D), jnp.float32,
                            -1.0 / jnp.sqrt(D), 1.0 / jnp.sqrt(D))
    bc = jax.random.uniform(keys[5], (1, HIDDEN), jnp.float32,
                            -1.0 / jnp.sqrt(D), 1.0 / jnp.sqrt(D))

    # output: Linear(128, 1)
    wo = jax.random.uniform(keys[6], (1, HIDDEN), jnp.float32,
                            -1.0 / jnp.sqrt(HIDDEN), 1.0 / jnp.sqrt(HIDDEN))
    bo = jax.random.uniform(keys[7], (1, 1), jnp.float32,
                            -1.0 / jnp.sqrt(HIDDEN), 1.0 / jnp.sqrt(HIDDEN))

    wc_t = wc.T          # [D, 128]
    wo_t = wo.T          # [128, 1]

    # Wrapper-side fusion of the two bias-affine linears (no nonlinearity
    # between them): h @ Wc^T Wo^T + (bc Wo^T + bo).
    w_fused = (wc_t @ wo_t).T          # [1, D]
    b_fused = bc @ wo_t + bo           # [1, 1]

    return {
        "w2_t": w2.T,          # [D, D]  (in, out)
        "b2": b2,              # [1, D]
        "w_add": w_add,        # [1, D]
        "w_diff": w_diff,      # [1, D]
        "w_multi": w_multi,    # [1, D]
        # fused projection used by the kernel
        "w_fused": w_fused,    # [1, D]
        "b_fused": b_fused,    # [1, 1]  (scalar, lives in SMEM)
        # unfused weights kept for the reference implementation
        "wc_t": wc_t,          # [D, 128]
        "bc": bc,              # [1, 128]
        "wo_t": wo_t,          # [128, 1]
        "bo": bo,              # [1, 1]
    }


def match_lr_ref(submitter_emb, reviewer_emb, p):
    """Unfused reference — mirrors the PyTorch forward exactly."""
    r = reviewer_emb @ p["w2_t"] + p["b2"]
    add = submitter_emb + r
    diff = submitter_emb - r
    multi = submitter_emb * r
    h = (jnp.tanh(p["w_add"] * add)
         + jnp.tanh(p["w_diff"] * diff)
         + jnp.tanh(p["w_multi"] * multi))
    combo = h @ p["wc_t"] + p["bc"]
    return 3.0 * jax.nn.sigmoid(combo @ p["wo_t"] + p["bo"])


if __name__ == "__main__":
    key = jax.random.PRNGKey(0)
    k_sub, k_rev, k_params = jax.random.split(key, 3)

    batch_size = 10   # deliberately not a multiple of the tile -> exercises padding
    emb_dim = 32      # submitter_emb_dim == reviewer_emb_dim

    submitter_emb = jax.random.normal(k_sub, (batch_size, emb_dim), jnp.float32)
    reviewer_emb = jax.random.normal(k_rev, (batch_size, emb_dim), jnp.float32)
    params = init_params(k_params, emb_dim, emb_dim)

    # tb=8 -> padded batch of 16, grid of 2 tiles (exercises the pipeline and
    # resident-weight path even at this small test size).
    out = match_lr_forward(submitter_emb, reviewer_emb, params, tb=8)
    out = jax.block_until_ready(out)

    ref = match_lr_ref(submitter_emb, reviewer_emb, params)
    assert out.shape == (batch_size, 1), out.shape
    assert jnp.allclose(out, ref, atol=1e-4, rtol=1e-4), \
        f"max abs err {jnp.max(jnp.abs(out - ref))}"

    print("KERNEL_OK")
</pallas_src>

<mosaic_0001>
module attributes {stable_mosaic.version = 11 : i64} {
  func.func @match_lr_kernel(%arg0: i32, %arg1: memref<8x32xf32, #tpu.memory_space<vmem>>, %arg2: memref<8x32xf32, #tpu.memory_space<vmem>>, %arg3: memref<32x32xf32, #tpu.memory_space<vmem>>, %arg4: memref<1x32xf32, #tpu.memory_space<vmem>>, %arg5: memref<1x32xf32, #tpu.memory_space<vmem>>, %arg6: memref<1x32xf32, #tpu.memory_space<vmem>>, %arg7: memref<1x32xf32, #tpu.memory_space<vmem>>, %arg8: memref<1x32xf32, #tpu.memory_space<vmem>>, %arg9: memref<1x1xf32, #tpu.memory_space<smem>>, %arg10: memref<8x1xf32, #tpu.memory_space<vmem>>) attributes {dimension_semantics = [#tpu.dimension_semantics<parallel>], iteration_bounds = array<i64: 2>, scalar_prefetch = 0 : i64, scratch_operands = 0 : i64, tpu.core_type = #tpu.core_type<tc>, window_params = [{transform_indices = @transform_0, window_bounds = array<i64: 8, 32>}, {transform_indices = @transform_1, window_bounds = array<i64: 8, 32>}, {pipeline_mode = #tpu.pipeline_mode<synchronous>, transform_indices = @transform_2, window_bounds = array<i64: 32, 32>}, {pipeline_mode = #tpu.pipeline_mode<synchronous>, transform_indices = @transform_3, window_bounds = array<i64: 1, 32>}, {pipeline_mode = #tpu.pipeline_mode<synchronous>, transform_indices = @transform_4, window_bounds = array<i64: 1, 32>}, {pipeline_mode = #tpu.pipeline_mode<synchronous>, transform_indices = @transform_5, window_bounds = array<i64: 1, 32>}, {pipeline_mode = #tpu.pipeline_mode<synchronous>, transform_indices = @transform_6, window_bounds = array<i64: 1, 32>}, {pipeline_mode = #tpu.pipeline_mode<synchronous>, transform_indices = @transform_7, window_bounds = array<i64: 1, 32>}, {transform_indices = @transform_8, window_bounds = array<i64: 1, 1>}, {transform_indices = @transform_9, window_bounds = array<i64: 8, 1>}]} {
    %c0 = arith.constant 0 : index
    %c0_0 = arith.constant 0 : index
    %0 = vector.load %arg2[%c0, %c0_0] : memref<8x32xf32, #tpu.memory_space<vmem>>, vector<8x32xf32>
    %c0_1 = arith.constant 0 : index
    %c0_2 = arith.constant 0 : index
    %1 = vector.load %arg3[%c0_1, %c0_2] : memref<32x32xf32, #tpu.memory_space<vmem>>, vector<32x32xf32>
    %cst = arith.constant dense<0.000000e+00> : vector<8x32xf32>
    %2 = tpu.matmul %0, %1, %cst {dimension_numbers = #tpu.dot_dimension_numbers<[1], [0], [0], [1], [0, 0, 1, 1], [], []>} : vector<8x32xf32>, vector<32x32xf32>, vector<8x32xf32> -> vector<8x32xf32>
    %c0_3 = arith.constant 0 : index
    %c0_4 = arith.constant 0 : index
    %3 = vector.load %arg4[%c0_3, %c0_4] : memref<1x32xf32, #tpu.memory_space<vmem>>, vector<1x32xf32>
    %4 = vector.broadcast %3 : vector<1x32xf32> to vector<8x32xf32>
    %5 = arith.addf %2, %4 : vector<8x32xf32>
    %c0_5 = arith.constant 0 : index
    %c0_6 = arith.constant 0 : index
    %6 = vector.load %arg1[%c0_5, %c0_6] : memref<8x32xf32, #tpu.memory_space<vmem>>, vector<8x32xf32>
    %7 = arith.addf %6, %5 : vector<8x32xf32>
    %8 = arith.subf %6, %5 : vector<8x32xf32>
    %9 = arith.mulf %6, %5 : vector<8x32xf32>
    %c0_7 = arith.constant 0 : index
    %c0_8 = arith.constant 0 : index
    %10 = vector.load %arg5[%c0_7, %c0_8] : memref<1x32xf32, #tpu.memory_space<vmem>>, vector<1x32xf32>
    %11 = vector.broadcast %10 : vector<1x32xf32> to vector<8x32xf32>
    %12 = arith.mulf %11, %7 : vector<8x32xf32>
    %13 = math.tanh %12 : vector<8x32xf32>
    %c0_9 = arith.constant 0 : index
    %c0_10 = arith.constant 0 : index
    %14 = vector.load %arg6[%c0_9, %c0_10] : memref<1x32xf32, #tpu.memory_space<vmem>>, vector<1x32xf32>
    %15 = vector.broadcast %14 : vector<1x32xf32> to vector<8x32xf32>
    %16 = arith.mulf %15, %8 : vector<8x32xf32>
    %17 = math.tanh %16 : vector<8x32xf32>
    %18 = arith.addf %13, %17 : vector<8x32xf32>
    %c0_11 = arith.constant 0 : index
    %c0_12 = arith.constant 0 : index
    %19 = vector.load %arg7[%c0_11, %c0_12] : memref<1x32xf32, #tpu.memory_space<vmem>>, vector<1x32xf32>
    %20 = vector.broadcast %19 : vector<1x32xf32> to vector<8x32xf32>
    %21 = arith.mulf %20, %9 : vector<8x32xf32>
    %22 = math.tanh %21 : vector<8x32xf32>
    %23 = arith.addf %18, %22 : vector<8x32xf32>
    %c0_13 = arith.constant 0 : index
    %c0_14 = arith.constant 0 : index
    %24 = vector.load %arg8[%c0_13, %c0_14] : memref<1x32xf32, #tpu.memory_space<vmem>>, vector<1x32xf32>
    %25 = vector.broadcast %24 : vector<1x32xf32> to vector<8x32xf32>
    %26 = arith.mulf %23, %25 : vector<8x32xf32>
    %cst_15 = arith.constant dense<0.000000e+00> : vector<8xf32>
    %27 = vector.multi_reduction <add>, %26, %cst_15 [1] : vector<8x32xf32> to vector<8xf32>
    %28 = vector.shape_cast %27 : vector<8xf32> to vector<8x1xf32>
    %c0_16 = arith.constant 0 : index
    %c0_17 = arith.constant 0 : index
    %29 = memref.load %arg9[%c0_16, %c0_17] : memref<1x1xf32, #tpu.memory_space<smem>>
    %30 = vector.broadcast %29 : f32 to vector<8x1xf32>
    %31 = arith.addf %28, %30 : vector<8x1xf32>
    %32 = arith.negf %31 : vector<8x1xf32>
    %33 = math.exp %32 : vector<8x1xf32>
    %cst_18 = arith.constant 1.000000e+00 : f32
    %34 = vector.broadcast %cst_18 : f32 to vector<8x1xf32>
    %35 = arith.addf %34, %33 : vector<8x1xf32>
    %36 = arith.divf %34, %35 : vector<8x1xf32>
    %cst_19 = arith.constant 3.000000e+00 : f32
    %37 = vector.broadcast %cst_19 : f32 to vector<8x1xf32>
    %38 = arith.mulf %37, %36 : vector<8x1xf32>
    %c0_20 = arith.constant 0 : index
    %c0_21 = arith.constant 0 : index
    %39 = vector.load %arg10[%c0_20, %c0_21] : memref<8x1xf32, #tpu.memory_space<vmem>>, vector<8x1xf32>
    tpu.vector_store %arg10[%c0_20, %c0_21], %38 {strides = array<i32>} : memref<8x1xf32, #tpu.memory_space<vmem>>, vector<8x1xf32>,
    return
  }
  func.func @transform_0(%arg0: i32) -> (i32, i32) {
    %c0_i32 = arith.constant 0 : i32
    %c0_i32_0 = arith.constant 0 : i32
    return %arg0, %c0_i32 : i32, i32
  }
  func.func @transform_1(%arg0: i32) -> (i32, i32) {
    %c0_i32 = arith.constant 0 : i32
    %c0_i32_0 = arith.constant 0 : i32
    return %arg0, %c0_i32 : i32, i32
  }
  func.func @transform_2(%arg0: i32) -> (i32, i32) {
    %c0_i32 = arith.constant 0 : i32
    %c0_i32_0 = arith.constant 0 : i32
    %c0_i32_1 = arith.constant 0 : i32
    return %c0_i32, %c0_i32_0 : i32, i32
  }
  func.func @transform_3(%arg0: i32) -> (i32, i32) {
    %c0_i32 = arith.constant 0 : i32
    %c0_i32_0 = arith.constant 0 : i32
    %c0_i32_1 = arith.constant 0 : i32
    return %c0_i32, %c0_i32_0 : i32, i32
  }
  func.func @transform_4(%arg0: i32) -> (i32, i32) {
    %c0_i32 = arith.constant 0 : i32
    %c0_i32_0 = arith.constant 0 : i32
    %c0_i32_1 = arith.constant 0 : i32
    return %c0_i32, %c0_i32_0 : i32, i32
  }
  func.func @transform_5(%arg0: i32) -> (i32, i32) {
    %c0_i32 = arith.constant 0 : i32
    %c0_i32_0 = arith.constant 0 : i32
    %c0_i32_1 = arith.constant 0 : i32
    return %c0_i32, %c0_i32_0 : i32, i32
  }
  func.func @transform_6(%arg0: i32) -> (i32, i32) {
    %c0_i32 = arith.constant 0 : i32
    %c0_i32_0 = arith.constant 0 : i32
    %c0_i32_1 = arith.constant 0 : i32
    return %c0_i32, %c0_i32_0 : i32, i32
  }
  func.func @transform_7(%arg0: i32) -> (i32, i32) {
    %c0_i32 = arith.constant 0 : i32
    %c0_i32_0 = arith.constant 0 : i32
    %c0_i32_1 = arith.constant 0 : i32
    return %c0_i32, %c0_i32_0 : i32, i32
  }
  func.func @transform_8(%arg0: i32) -> (i32, i32) {
    %c0_i32 = arith.constant 0 : i32
    %c0_i32_0 = arith.constant 0 : i32
    %c0_i32_1 = arith.constant 0 : i32
    return %c0_i32, %c0_i32_0 : i32, i32
  }
  func.func @transform_9(%arg0: i32) -> (i32, i32) {
    %c0_i32 = arith.constant 0 : i32
    %c0_i32_0 = arith.constant 0 : i32
    return %arg0, %c0_i32 : i32, i32
  }
}

</mosaic_0001>

<bundles_post_ra>
// kernel: tpu_custom_call.1
= control target key start
LH: loop header
LB: loop body
LE: loop exit
PB: predicated region body
PF: predicated region fallthrough
CT: control target
= control target key end

     0   :  { %s1019_s0 = inlined_call_operand.hbm [shape: f32[16,32], index: 0, kind: input, shape index: {}]   ;;  %s1020_s1 = inlined_call_operand.hbm [shape: f32[16,32], index: 1, kind: input, shape index: {}]   ;;  %s1021_s2 = inlined_call_operand.hbm [shape: f32[32,32], index: 2, kind: input, shape index: {}]   ;;  %s1022_s3 = inlined_call_operand.vmem [shape: f32[1,32], index: 3, kind: input, shape index: {}]   ;;  %s1023_s4 = inlined_call_operand.vmem [shape: f32[1,32], index: 4, kind: input, shape index: {}]   ;;  %s1024_s5 = inlined_call_operand.vmem [shape: f32[1,32], index: 5, kind: input, shape index: {}]   ;;  %s1025_s6 = inlined_call_operand.vmem [shape: f32[1,32], index: 6, kind: input, shape index: {}]   ;;  %s1026_s7 = inlined_call_operand.vmem [shape: f32[1,32], index: 7, kind: input, shape index: {}]   ;;  %s1027_s8 = inlined_call_operand.<no memory space> [shape: f32[1,1], index: 8, kind: input, shape index: {}]   ;;  %s1028_s9 = inlined_call_operand.vmem [shape: f32[16,1], index: 9, kind: output, shape index: {}]  }
   0x1   :  { %1030 = sst [smem:[#allocation13_spill]] %s1021_s2 }
   0x2   :  { %14 = sst [smem:[#allocation2]] %s1027_s8 }
   0x3   :  { %15 = vsyncpa [#allocation4], 0 }
   0x4   :  { %17 = vsyncpa [#allocation4 + $0x1], 0 }
   0x5   :  { %18 = vsyncpa [#allocation6], 0 }
   0x6   :  { %20 = vsyncpa [#allocation6 + $0x1], 0  ;;  %s872_s11 = smov 0   ;;  %s874_s12 = smov 0  }
   0x7   :  { %s876_s13 = smov 0   ;;  %s878_s14 = smov 0  }
   0x8 LB: > { %1031 = sst [smem:[#allocation11_spill]] %s810_s13  ;;  %s894_s17 = sadd.s32 4294967295, %s814_s14   ;;  %s814_s14 = sphi %s878_s14, %s1041_s14   ;;  %s810_s13 = sphi %s876_s13, %s1038_s13   ;;  %s806_s12 = sphi %s874_s12, %s1040_s12   ;;  %s802_s11 = sphi %s872_s11, %s1039_s11  }
   0x9   : > { %s1032_s2 = sld [smem:[#allocation13_spill]]  ;;  %p594_p0 = scmp.ge.s32.totalorder %s814_s14, 1 }
   0xa   : > { %p47_p1 = scmp.eq.s32.totalorder %s894_s17, 0  ;;  %p256_p2 = scmp.lt.s32.totalorder %s814_s14, 3 }
   0xb   : > { %s816_s19 = smov [#allocation7]   ;;  %s817_s21 = smov 128  }
   0xc   : > { %p899_p3 = pnand %p594_p0, %p256_p2  ;;  %s269_s20 = sshll.u32 %s816_s19, 4  ;;  %s270_s20 = int_to_ptr.vmem [resolvable:$true] %s269_s20 }
   0xd   : > { %s818_s22 = smov 8   ;;  %s908_s23 = sadd.s32 1, %s814_s14  }
   0xe   : > { %p618_p4 = pneg %p899_p3  ;;  %s30_s24 = ssub.s32 %s814_s14, %s908_s23 }
   0xf   : > { %s267_s16 = sshll.u32 %s1032_s2, 4  ;;  %s33_s25 = sadd.s32 1, %s810_s13  ;;  %s268_s16 = int_to_ptr.hbm [resolvable:$true] %s267_s16 }
  0x10   : > { %p619_p5 = pnand %p618_p4, %p47_p1  ;;  %p31_p6 = scmp.eq.s32.totalorder %s30_s24, 0 }
  0x11   : > { %p40_p7 = scmp.ne.s32.totalorder %s810_s13, %s806_s12  ;;  %p41_p8 = scmp.eq.s32.totalorder %s814_s14, 0 }
  0x12   : > { %621 = dma.hbm_to_vmem [thread:$0]  (!%p619_p5), %s268_s16, 512, %s270_s20, [#allocation6], %s817_s21, %s817_s21, %s818_s22  }
  0x13   : > { %p46_p9 = scmp.ne.s32.totalorder %s806_s12, %s802_s11  ;;  %p42_p10 = por %p41_p8, %p40_p7 }
  0x14   : > { %s918_s26 = scalar_select %p31_p6, %s810_s13, %s33_s25  }
  0x15   : > { %p922_p11 = por %p47_p1, %p46_p9  ;;  %p630_p12 = scmp.lt.s32.totalorder %s814_s14, 2 }
  0x16   : > { %1034 = sst [smem:[#allocation12_spill]] %s918_s26  ;;  %s301_s28 = sand.u32 1, %s810_s13  }
  0x17   : > { %s928_s29 = sshll.u32 %s301_s28, 3  ;;  %s598_s30 = sshll.u32 %s814_s14, 3 }
  0x18   : > { %s309_s15 = scalar_lea.hbm %s1019_s0, %s598_s30  ;;  %s305_s11 = scalar_lea.vmem [#allocation3], %s928_s29 }
  0x19   : > { %s313_s16 = sshll.u32 %s305_s11, 4  ;;  %s311_s19 = sshll.u32 %s309_s15, 4  ;;  %s314_s16 = int_to_ptr.vmem [resolvable:$true] %s313_s16  ;;  %s312_s19 = int_to_ptr.hbm [resolvable:$true] %s311_s19 }
  0x1a   : > { %p935_p13 = pnand %p630_p12, %p42_p10  ;;  %s328_s24 = scalar_lea.hbm %s1020_s1, %s598_s30 }
  0x1b   : > { %s320_s25 = sand.u32 1, %s814_s14   ;;  %s302_s2 = scalar_lea.sflag [#allocation4], %s301_s28 }
  0x1c   : > { %s712_s26 = sshra.s32 %s312_s19, 4  ;;  %p716_p2 = pneg %p935_p13  ;;  %s713_s26 = int_to_ptr.hbm [resolvable:$true] %s712_s26 }
  0x1d   : > { %s714_s10 = scalar_lea.hbm %s713_s26, 8  ;;  %s719_s11 = scalar_lea.hbm %s1019_s0, 16 }
  0x1e   : > { %p715_p0 = scmp.ne.s32.totalorder %s713_s26, %s714_s10  ;;  %p720_p6 = scmp.lt.s32.totalorder %s713_s26, %s1019_s0 }
  0x1f   : > { %p721_p7 = scmp.lt.s32.totalorder %s719_s11, %s714_s10 }
  0x20   : > { %p717_p4 = pnand %p716_p2, %p715_p0 }
  0x21   : > { %p722_p8 = por %p721_p7, %p720_p6 }
  0x22   : > { %p718_p5 = pneg %p717_p4 }
  0x24   : > { %p723_p9 = pnand %p722_p8, %p718_p5 }
  0x26   : > { %726 = shalt.err (!%p723_p9)
}
  0x27   : > { %625 = dma.hbm_to_vmem [thread:$0]  (!%p935_p13), %s312_s19, 128, %s314_s16, %s302_s2  }
  0x28   : > { %s330_s14 = sshll.u32 %s328_s24, 4  ;;  %s324_s28 = scalar_lea.vmem [#allocation5], %s928_s29  ;;  %s331_s14 = int_to_ptr.hbm [resolvable:$true] %s330_s14 }
  0x29   : > { %s332_s30 = sshll.u32 %s324_s28, 4  ;;  %s321_s8 = scalar_lea.sflag [#allocation6], %s320_s25  ;;  %s333_s30 = int_to_ptr.vmem [resolvable:$true] %s332_s30 }
  0x2a   : > { %s742_s15 = sshra.s32 %s331_s14, 4  ;;  %s749_s11 = scalar_lea.hbm %s1020_s1, 16  ;;  %s743_s15 = int_to_ptr.hbm [resolvable:$true] %s742_s15 }
  0x2b   : > { %s744_s13 = scalar_lea.hbm %s743_s15, 8  ;;  %p750_p4 = scmp.lt.s32.totalorder %s743_s15, %s1020_s1 }
  0x2c   : > { %p745_p10 = scmp.ne.s32.totalorder %s743_s15, %s744_s13  ;;  %p751_p5 = scmp.lt.s32.totalorder %s749_s11, %s744_s13 }
  0x2e   : > { %p747_p12 = pnand %p745_p10, %p716_p2  ;;  %p752_p6 = por %p751_p5, %p750_p4 }
  0x30   : > { %p748_p0 = pneg %p747_p12 }
  0x32   : > { %p753_p7 = pnand %p752_p6, %p748_p0 }
  0x34   : > { %756 = shalt.err (!%p753_p7)
}
  0x35   : > { %628 = dma.hbm_to_vmem [thread:$0]  (!%p935_p13), %s331_s14, 128, %s333_s30, %s321_s8  }
  0x36   : > { %341 = sbr.rel (%p899_p3) target bundleno = 369 (0x171), region = 56  ;;  %s343_s29 = sand.u32 (!%p899_p3), 1, %s806_s12  }
  0x37   : > { %s602_s16 = sshll.u32 (!%p899_p3), %s343_s29, 3  ;;  %s344_s19 = scalar_lea.sflag (!%p899_p3), [#allocation4], %s343_s29 }
  0x38   : > { %s347_s24 = scalar_lea.vmem (!%p899_p3), [#allocation3], %s602_s16 }
  0x3b   : > { %789 = dma.done.wait (%p922_p11), %s344_s19, 128  }
  0x3c   : > { %791 = vsyncadd (%p922_p11), %s344_s19, 4294967168  ;;  %s353_s13 = sand.u32 1, %s894_s17   ;;  %s357_s20 = scalar_lea.vmem [#allocation5], %s602_s16 }
  0x3d   : > { %s354_s25 = scalar_lea.sflag [#allocation6], %s353_s13 }
  0x3e   : > { %793 = dma.done.wait (%p922_p11), %s354_s25, 128  }
  0x3f   : > { %795 = vsyncadd (%p922_p11), %s354_s25, 4294967168 }
  0x40   : > { %797 = dma.done.wait (%p47_p1), [#allocation6], 512  }
  0x41   : > { %799 = vsyncadd (%p47_p1), [#allocation6], 4294966784  ;;  %v410_v0 = vld [vmem:[#allocation7 + $0x18] sm:$0xff]  ;;  %v409_v1 = vld [vmem:[#allocation7 + $0x10] sm:$0xff]  ;;  %vm415_vm0 = vcmask 261120   ;;  %s471_s11 = sld [smem:[#allocation2]] }
  0x42   : > { %431 = vmatpush.msra.mxu0 %v410_v0  ;;  %v408_v2 = vld [vmem:[#allocation7 + $0x8] sm:$0xff]  ;;  %v407_v3 = vld [vmem:[#allocation7] sm:$0xff]  ;;  %v406_v4 = vld [vmem:[%s357_s20] sm:$0xff]  ;;  %p402_p1 = scmp.lt.s32.totalorder %s894_s17, 1  ;;  %vm494_vm5 = vcmask 7168  }
  0x43   : > { %v667_v5 = vld [vmem:[%s1022_s3] ss:$0 sm:$0xff] }
  0x44   : > { %432 = vmatpush.msra.mxu0 %v409_v1  ;;  %v439_v7 = vld [vmem:[%s347_s24] sm:$0xff]  ;;  %s1043_s17 = smov (!%p402_p1, %s894_s17), 1 }
  0x45   : > { %v668_v9 = vld [vmem:[%s1023_s4] ss:$0 sm:$0xff]  ;;  %s605_s21 = sshll.u32 %s1043_s17, 3 }
  0x46   : > { %433 = vmatpush.msra.mxu0 %v408_v2  ;;  %v669_v10 = vld [vmem:[%s1024_s5] ss:$0 sm:$0xff]  ;;  %s405_s16 = scalar_lea.vmem %s1028_s9, %s605_s21 }
  0x47   : > { %v670_v11 = vld [vmem:[%s1025_s6] ss:$0 sm:$0xff]  ;;  %v472_v26 = vstv %s471_s11 }
  0x48   : > { %434 = vmatpush.msra.mxu0 %v407_v3  ;;  %v671_v21 = vld [vmem:[%s1026_s7] ss:$0 sm:$0xff] }
  0x49   : > { %606 = vmatmul.msk.f32.vlgmr.msra.gmra.mxu0 %vm415_vm0, %v406_v4 }
  0xc6   : > { %v436_v6 = vpop.f32.mrf.mxu0 }
  0xc7   : > { %v437_v8 = vadd.f32 %v667_v5, %v436_v6 }
  0xc9   : > { %v440_v12 = vadd.f32 %v439_v7, %v437_v8  ;;  %v441_v13 = vsub.f32 %v439_v7, %v437_v8  ;;  %v442_v14 = vmul.f32 %v439_v7, %v437_v8 }
  0xcb   : > { %v447_v15 = vmul.f32 %v668_v9, %v440_v12  ;;  %v453_v16 = vmul.f32 %v669_v10, %v441_v13  ;;  %v460_v17 = vmul.f32 %v670_v11, %v442_v14 }
  0xcd   : > { %672 = vtanh.f32 %v447_v15 }
  0xce   : > { %674 = vtanh.f32 %v453_v16 }
  0xcf   : > { %676 = vtanh.f32 %v460_v17 }
  0xd3   : > { %v673_v18 = vpop.eup %672 }
  0xd4   : > { %v675_v19 = vpop.eup %674 }
  0xd5   : > { %v455_v20 = vadd.f32 %v675_v19, %v673_v18  ;;  %v677_v22 = vpop.eup %676 }
  0xd7   : > { %v462_v23 = vadd.f32 %v677_v22, %v455_v20 }
  0xd9   : > { %v467_v24 = vmul.f32 %v671_v21, %v462_v23 }
  0xdb   : > { %v468_v25 = vsel %vm415_vm0, %v467_v24, 0.0 }
  0xdc   : > { %469 = vadd.xlane.f32.xlu0 %v468_v25 }
 0x14f   : > { %v470_v27 = vpop.xlane.xlu0 %469 }
 0x150   : > { %v473_v28 = vadd.f32 %v472_v26, %v470_v27 }
 0x152   : > { %v607_v29 = vmul.f32 -1.442695, %v473_v28 }
 0x154   : > { %678 = vpow2.f32 %v607_v29 }
 0x15a   : > { %v679_v30 = vpop.eup %678 }
 0x15b   : > { %v477_v31 = vadd.f32 1.0, %v679_v30 }
 0x15d   : > { %680 = vrcp.f32 %v477_v31  ;;  %v489_v35 = vand.u32 2147483648, %v477_v31  ;;  %v487_v37 = vand.u32 2147483647, %v477_v31  ;;  %vm483_vm2 = vweird.f32 %v477_v31 }
 0x15f   : > { %v490_v39 = vor.u32 1.1754944e-38, %v489_v35  ;;  %vm488_vm4 = vcmp.eq.f32.partialorder %v487_v37, 8.507059e+37 }
 0x163   : > { %v681_v32 = vpop.eup %680 }
 0x164   : > { %v479_v33 = vmul.f32 %v681_v32, %v477_v31  ;;  %vm484_vm1 = vweird.f32 %v681_v32 }
 0x165   : > { %vm485_vm3 = vmor %vm483_vm2, %vm484_vm1 }
 0x166   : > { %v480_v34 = vsub.f32 1.0, %v479_v33 }
 0x168   : > { %v481_v36 = vmul.f32 %v681_v32, %v480_v34 }
 0x16a   : > { %v482_v38 = vadd.f32 %v681_v32, %v481_v36 }
 0x16c   : > { %v486_v40 = vsel %vm485_vm3, %v681_v32, %v482_v38 }
 0x16d   : > { %v491_v41 = vsel %vm488_vm4, %v490_v39, %v486_v40 }
 0x16e   : > { %v493_v42 = vmul.f32 3.0, %v491_v41 }
 0x170   : > { %495 = vst.msk [vmem:[%s405_s16] sm:$0xff] %vm494_vm5, %v493_v42 }
 0x171 PF: > { %s1037_s19 = sld [smem:[#allocation11_spill]]  ;;  %p23_p3 = scmp.ge.s32.totalorder %s908_s23, 4  }
 0x172   : > { %s1038_s13 = sld [smem:[#allocation12_spill]]  ;;  %s1039_s11 = smov %s806_s12 }
 0x173   : > { %s1041_s14 = smov %s908_s23  ;;  %25 = sbr.rel (!%p23_p3) target bundleno = 8 (0x8), region = 113 }
 0x177   : > { %s1040_s12 = smov %s1037_s19 }
 0x178   :  { %515 = vsyncpa [#allocation4], 1 }
 0x179   :  { %517 = vsyncpa [#allocation4 + $0x1], 1 }
 0x17a   :  { %518 = vsyncpa [#allocation6], 1 }
 0x17b   :  { %520 = vsyncpa [#allocation6 + $0x1], 1 }

</bundles_post_ra>
